<compile_context>
chip_gen: v6e
topology: v6e:2x2x1
jax: 0.10.0
libtpu: 0.0.40
codegen_flags: <defaults>
</compile_context>

<pallas_src>
import functools

import jax
import jax.numpy as jnp
from jax.experimental import pallas as pl
from jax.experimental.pallas import tpu as pltpu


def _cdiv(a, b):
    return -(-a // b)


def _round_up(a, b):
    return _cdiv(a, b) * b


def _default_num_parallel():
    # The parallel leading grid axis only pays on chips where two TensorCores
    # share HBM (v7x; megacore v4/v5p).  On single-TC v5e/v6e it just adds a
    # grid boundary for zero benefit.
    try:
        kind = jax.devices()[0].device_kind.lower()
    except Exception:
        return 1
    if ("v7" in kind) or ("v4" in kind) or ("v5p" in kind):
        return 2
    return 1


def _filter_mse_kernel(pred_ref, gold_ref, mask_ref, out_ref, *,
                       tile_rows, n_cols, n_r, sub_rows,
                       needs_row_mask, valid_rows):
    """Blocks: pred/gold (tile_rows, n_cols), mask int8 (tile_rows, n_cols),
    out (1, 8, n_cols) persistent f32 accumulator (constant block index along
    the 'arbitrary' reduction axis)."""
    p = pl.program_id(0)      # parallel chunk (TensorCore)
    i = pl.program_id(1)      # reduction step within the chunk

    @pl.when(i == 0)
    def _():
        out_ref[...] = jnp.zeros_like(out_ref)

    # UNclamped global row offset of this tile.  Tiles whose rows fall at or
    # beyond `valid_rows` (ragged tail, or duplicated over-coverage tiles whose
    # DMA the index_map clamped onto the last in-range block) are zeroed by the
    # row mask below — no reliance on padded data values.
    tile_row0 = (p * n_r + i) * tile_rows

    def contrib(r0, nrows):
        d = (pred_ref[pl.ds(r0, nrows), :].astype(jnp.float32)
             - gold_ref[pl.ds(r0, nrows), :].astype(jnp.float32))
        c = d * d * mask_ref[pl.ds(r0, nrows), :].astype(jnp.float32)
        if needs_row_mask:
            rows = tile_row0 + r0 + jax.lax.broadcasted_iota(
                jnp.int32, (nrows, n_cols), 0)
            c = jnp.where(rows < valid_rows, c, 0.0)
        return c

    # ---- main loop: fixed 256-row sub-chunks, accumulated directly into the
    # (8, n_cols) accumulator.  No full-tile intermediate is materialized.
    n_full = tile_rows // sub_rows                        # static
    if n_full > 0:
        def body(s, carry):
            r0 = pl.multiple_of(s * sub_rows, sub_rows)
            c = contrib(r0, sub_rows)
            # (sub, N) -> (sub//8, 8, N); leading-axis sum = pure VPU vreg adds.
            out_ref[0] += jnp.sum(c.reshape(sub_rows // 8, 8, n_cols), axis=0)
            return carry
        jax.lax.fori_loop(0, n_full, body, 0, unroll=True)

    # ---- static remainders (only emitted when tile_rows % sub_rows != 0).
    rem_base = n_full * sub_rows
    rem = tile_rows - rem_base
    rem8 = (rem // 8) * 8
    if rem8 > 0:
        c = contrib(rem_base, rem8)
        out_ref[0] += jnp.sum(c.reshape(rem8 // 8, 8, n_cols), axis=0)
    tail = rem - rem8                                     # < 8 rows
    if tail > 0:
        c = contrib(rem_base + rem8, tail)
        out_ref[0, 0:1, :] += jnp.sum(c, axis=0, keepdims=True)


def filter_mse_loss(pred, gold, raw, col_names, *,
                    max_tile_rows=8192,
                    num_parallel=None,
                    input_buffer_count=2,
                    vmem_input_budget_bytes=40 * 1024 * 1024,
                    vmem_limit_bytes=48 * 1024 * 1024,
                    sub_rows=256):
    """pred, gold: [B, T, N]; raw: [B, T, N, C] (feature axis last)."""
    assert pred.shape == gold.shape
    n_cols = int(pred.shape[-1])
    total = int(pred.size)
    m_rows = total // n_cols

    # ---- filter mask from `raw` in its NATIVE [..., C] layout (fuses with the
    # read of raw in XLA).  Stored as int8 -> 1 byte/elem of kernel HBM traffic.
    r = lambda name: raw[..., col_names[name]]
    patv = r('Patv')
    bad = patv < 0.0
    bad = bad | (r('Pab1') > 89.0) | (r('Pab2') > 89.0) | (r('Pab3') > 89.0)
    bad = bad | (r('Wdir') < -180.0) | (r('Wdir') > 180.0)
    bad = bad | (r('Ndir') < -720.0) | (r('Ndir') > 720.0)
    bad = bad | ((patv == 0.0) & (r('Wspd') > 2.5))
    mask = jnp.logical_not(bad).astype(jnp.int8)

    # ---- zero-copy 2D views (contiguous reshape).  NO jnp.pad anywhere.
    pred2 = pred.reshape(m_rows, n_cols)
    gold2 = gold.reshape(m_rows, n_cols)
    mask2 = mask.reshape(m_rows, n_cols)

    # ---- tile geometry, sized against an explicit VMEM budget.
    p_chunks = int(num_parallel) if num_parallel is not None else _default_num_parallel()
    p_chunks = max(1, p_chunks)
    sub_rows = max(8, (int(sub_rows) // 8) * 8)

    lanes_pad = _round_up(n_cols, 128)                    # VMEM lane padding
    bytes_per_row = lanes_pad * (pred.dtype.itemsize + gold.dtype.itemsize + 1)
    bufs = max(2, int(input_buffer_count))
    cap_rows = max(256, vmem_input_budget_bytes // (bufs * bytes_per_row))
    tm_target = max(32, (min(int(max_tile_rows), int(cap_rows)) // 32) * 32)

    if m_rows <= tm_target:
        tm = m_rows                     # single full-extent row block
    else:
        tm = tm_target                  # multiple of 32 (int8 / bf16 tiling)
    n_blocks = _cdiv(m_rows, tm)
    p_chunks = min(p_chunks, n_blocks)  # never create pure-waste chunks
    n_r = _cdiv(n_blocks, p_chunks)
    needs_row_mask = p_chunks * n_r * tm > m_rows
    last_block = n_blocks - 1

    def in_index_map(p, i):
        # Clamp over-coverage tiles onto the last in-range block (their
        # contribution is zeroed in-kernel by the row mask).
        return (jnp.minimum(p * n_r + i, last_block), 0)

    in_spec_kwargs = {}
    if bufs != 2 and hasattr(pl, "Buffered"):
        # Deeper input pipelining (review: useful on v7x where per-step DMA is
        # short enough that the issue gap is exposed).
        in_spec_kwargs["pipeline_mode"] = pl.Buffered(bufs)
    in_spec = pl.BlockSpec((tm, n_cols), in_index_map, **in_spec_kwargs)

    kernel = functools.partial(
        _filter_mse_kernel,
        tile_rows=tm, n_cols=n_cols, n_r=n_r, sub_rows=sub_rows,
        needs_row_mask=needs_row_mask, valid_rows=m_rows)

    partial_sums = pl.pallas_call(
        kernel,
        out_shape=jax.ShapeDtypeStruct((p_chunks, 8, n_cols), jnp.float32),
        grid_spec=pltpu.PrefetchScalarGridSpec(
            num_scalar_prefetch=0,
            grid=(p_chunks, n_r),
            in_specs=[in_spec, in_spec, in_spec],
            out_specs=pl.BlockSpec((1, 8, n_cols), lambda p, i: (p, 0, 0)),
        ),
        compiler_params=pltpu.CompilerParams(
            dimension_semantics=("parallel", "arbitrary"),
            vmem_limit_bytes=int(vmem_limit_bytes)),
    )(pred2, gold2, mask2)

    # Tiny epilogue reduce (p_chunks * 8 * n_cols elements) + mean scaling.
    return jnp.sum(partial_sums) / jnp.float32(total)


def _reference(pred, gold, raw, cn):
    r = lambda name: raw[:, :, :, cn[name]]
    cond1 = r('Patv') < 0
    cond2 = r('Pab1') > 89
    cond2 = cond2 | (r('Pab2') > 89) | (r('Pab3') > 89)
    cond2 = cond2 | (r('Wdir') < -180) | (r('Wdir') > 180)
    cond2 = cond2 | (r('Ndir') < -720) | (r('Ndir') > 720)
    cond2 = cond2 | cond1
    cond3 = (r('Patv') == 0) & (r('Wspd') > 2.5)
    cond3 = cond3 | cond2
    cond = jnp.logical_not(cond3).astype(jnp.float32)
    return jnp.mean((pred - gold) ** 2 * cond)


if __name__ == "__main__":
    col_names = {
        'Wspd': 0, 'Wdir': 1, 'Ndir': 2,
        'Pab1': 3, 'Pab2': 4, 'Pab3': 5,
        'Patv': 6,
    }
    C = 10

    def make(key, B, T, N):
        k1, k2, k3 = jax.random.split(key, 3)
        pred = jax.random.normal(k1, (B, T, N), dtype=jnp.float32)
        gold = jax.random.normal(k2, (B, T, N), dtype=jnp.float32)
        raw = jax.random.uniform(
            k3, (B, T, N, C), minval=-100.0, maxval=100.0, dtype=jnp.float32)
        return pred, gold, raw

    # 1) Small shapes implied by the module (single full-extent tile path).
    pred, gold, raw = make(jax.random.PRNGKey(0), 2, 8, 16)
    loss = filter_mse_loss(pred, gold, raw, col_names)
    jax.block_until_ready(loss)
    expected = _reference(pred, gold, raw, col_names)
    assert jnp.allclose(loss, expected, rtol=1e-5, atol=1e-6), (loss, expected)

    # 2) Still tiny, but force the tiled / multi-chunk / ragged-tail path
    #    (no padding anywhere — the tail is masked in-kernel).
    pred, gold, raw = make(jax.random.PRNGKey(1), 2, 300, 16)
    loss = filter_mse_loss(pred, gold, raw, col_names,
                           max_tile_rows=256, num_parallel=2)
    jax.block_until_ready(loss)
    expected = _reference(pred, gold, raw, col_names)
    assert jnp.allclose(loss, expected, rtol=1e-5, atol=1e-6), (loss, expected)

    print("KERNEL_OK")
</pallas_src>

<mosaic_0001>
module attributes {stable_mosaic.version = 11 : i64} {
  func.func @_filter_mse_kernel(%arg0: i32, %arg1: i32, %arg2: memref<16x16xf32, #tpu.memory_space<vmem>>, %arg3: memref<16x16xf32, #tpu.memory_space<vmem>>, %arg4: memref<16x16xi8, #tpu.memory_space<vmem>>, %arg5: memref<1x8x16xf32, #tpu.memory_space<vmem>>) attributes {dimension_semantics = [#tpu.dimension_semantics<parallel>, #tpu.dimension_semantics<arbitrary>], iteration_bounds = array<i64: 1, 1>, scalar_prefetch = 0 : i64, scratch_operands = 0 : i64, tpu.core_type = #tpu.core_type<tc>, window_params = [{transform_indices = @transform_0, window_bounds = array<i64: 16, 16>}, {transform_indices = @transform_1, window_bounds = array<i64: 16, 16>}, {transform_indices = @transform_2, window_bounds = array<i64: 16, 16>}, {transform_indices = @transform_3, window_bounds = array<i64: 1, 8, 16>}]} {
    %c0_i32 = arith.constant 0 : i32
    %0 = arith.cmpi eq, %arg1, %c0_i32 : i32
    %1 = arith.extui %0 : i1 to i32
    %c0_i32_0 = arith.constant 0 : i32
    %2 = arith.cmpi ne, %1, %c0_i32_0 : i32
    scf.if %2 {
      %cst_12 = arith.constant 0.000000e+00 : f32
      %18 = vector.broadcast %cst_12 : f32 to vector<1x8x16xf32>
      %c0_13 = arith.constant 0 : index
      %c0_14 = arith.constant 0 : index
      %c0_15 = arith.constant 0 : index
      %19 = vector.load %arg5[%c0_13, %c0_14, %c0_15] : memref<1x8x16xf32, #tpu.memory_space<vmem>>, vector<1x8x16xf32>
      tpu.vector_store %arg5[%c0_13, %c0_14, %c0_15], %18 {strides = array<i32>} : memref<1x8x16xf32, #tpu.memory_space<vmem>>, vector<1x8x16xf32>,
    } else {
    }
    %c0 = arith.constant 0 : index
    %c0_1 = arith.constant 0 : index
    %3 = vector.load %arg2[%c0, %c0_1] : memref<16x16xf32, #tpu.memory_space<vmem>>, vector<16x16xf32>
    %c0_2 = arith.constant 0 : index
    %c0_3 = arith.constant 0 : index
    %4 = vector.load %arg3[%c0_2, %c0_3] : memref<16x16xf32, #tpu.memory_space<vmem>>, vector<16x16xf32>
    %5 = arith.subf %3, %4 : vector<16x16xf32>
    %6 = arith.mulf %5, %5 : vector<16x16xf32>
    %c0_4 = arith.constant 0 : index
    %c0_5 = arith.constant 0 : index
    %7 = vector.load %arg4[%c0_4, %c0_5] : memref<16x16xi8, #tpu.memory_space<vmem>>, vector<16x16xi8>
    %8 = arith.sitofp %7 : vector<16x16xi8> to vector<16x16xf32>
    %9 = arith.mulf %6, %8 : vector<16x16xf32>
    %c0_6 = arith.constant 0 : index
    %c0_7 = arith.constant 0 : index
    %c0_8 = arith.constant 0 : index
    %10 = vector.load %arg5[%c0_6, %c0_7, %c0_8] : memref<1x8x16xf32, #tpu.memory_space<vmem>>, vector<1x8x16xf32>
    %11 = vector.shape_cast %10 : vector<1x8x16xf32> to vector<8x16xf32>
    %12 = vector.shape_cast %9 : vector<16x16xf32> to vector<2x8x16xf32>
    %cst = arith.constant dense<0.000000e+00> : vector<8x16xf32>
    %13 = vector.multi_reduction <add>, %12, %cst [0] : vector<2x8x16xf32> to vector<8x16xf32>
    %14 = arith.addf %11, %13 : vector<8x16xf32>
    %c0_9 = arith.constant 0 : index
    %c0_10 = arith.constant 0 : index
    %c0_11 = arith.constant 0 : index
    %15 = vector.load %arg5[%c0_9, %c0_10, %c0_11] : memref<1x8x16xf32, #tpu.memory_space<vmem>>, vector<1x8x16xf32>
    %16 = vector.shape_cast %15 : vector<1x8x16xf32> to vector<8x16xf32>
    %17 = vector.shape_cast %14 : vector<8x16xf32> to vector<1x8x16xf32>
    tpu.vector_store %arg5[%c0_9, %c0_10, %c0_11], %17 {strides = array<i32>} : memref<1x8x16xf32, #tpu.memory_space<vmem>>, vector<1x8x16xf32>,
    return
  }
  func.func @transform_0(%arg0: i32, %arg1: i32) -> (i32, i32) {
    %c1_i32 = arith.constant 1 : i32
    %0 = arith.muli %arg0, %c1_i32 : i32
    %1 = arith.addi %0, %arg1 : i32
    %c0_i32 = arith.constant 0 : i32
    %2 = arith.minsi %1, %c0_i32 : i32
    %c0_i32_0 = arith.constant 0 : i32
    %c0_i32_1 = arith.constant 0 : i32
    return %2, %c0_i32_0 : i32, i32
  }
  func.func @transform_1(%arg0: i32, %arg1: i32) -> (i32, i32) {
    %c1_i32 = arith.constant 1 : i32
    %0 = arith.muli %arg0, %c1_i32 : i32
    %1 = arith.addi %0, %arg1 : i32
    %c0_i32 = arith.constant 0 : i32
    %2 = arith.minsi %1, %c0_i32 : i32
    %c0_i32_0 = arith.constant 0 : i32
    %c0_i32_1 = arith.constant 0 : i32
    return %2, %c0_i32_0 : i32, i32
  }
  func.func @transform_2(%arg0: i32, %arg1: i32) -> (i32, i32) {
    %c1_i32 = arith.constant 1 : i32
    %0 = arith.muli %arg0, %c1_i32 : i32
    %1 = arith.addi %0, %arg1 : i32
    %c0_i32 = arith.constant 0 : i32
    %2 = arith.minsi %1, %c0_i32 : i32
    %c0_i32_0 = arith.constant 0 : i32
    %c0_i32_1 = arith.constant 0 : i32
    return %2, %c0_i32_0 : i32, i32
  }
  func.func @transform_3(%arg0: i32, %arg1: i32) -> (i32, i32, i32) {
    %c0_i32 = arith.constant 0 : i32
    %c0_i32_0 = arith.constant 0 : i32
    %c0_i32_1 = arith.constant 0 : i32
    return %arg0, %c0_i32, %c0_i32_0 : i32, i32, i32
  }
}

</mosaic_0001>

<bundles_post_ra>
// kernel: tpu_custom_call.1
= control target key start
LH: loop header
LB: loop body
LE: loop exit
PB: predicated region body
PF: predicated region fallthrough
CT: control target
= control target key end

     0   :  { %8 = vsyncpa [#allocation3], 0  ;;  %s281_s0 = inlined_call_operand.hbm [shape: f32[16,16], index: 0, kind: input, shape index: {}]   ;;  %s282_s1 = inlined_call_operand.hbm [shape: f32[16,16], index: 1, kind: input, shape index: {}]   ;;  %s283_s2 = inlined_call_operand.hbm [shape: s8[16,16], index: 2, kind: input, shape index: {}]   ;;  %s284_s3 = inlined_call_operand.hbm [shape: f32[1,8,16], index: 3, kind: output, shape index: {}]  }
   0x1   :  { %9 = vsyncpa [#allocation6], 0 }
   0x2   :  { %10 = vsyncpa [#allocation4], 0  ;;  %s236_s12 = smov [#allocation5]   ;;  %s237_s14 = smov [#allocation2]  }
   0x3   :  { %s40_s13 = sshll.u32 %s236_s12, 4  ;;  %s22_s15 = sshll.u32 %s237_s14, 4  ;;  %s41_s13 = int_to_ptr.vmem [resolvable:$true] %s40_s13  ;;  %s23_s15 = int_to_ptr.vmem [resolvable:$true] %s22_s15 }
   0x4   :  { %s158_s16 = scalar_lea.vmem %s41_s13, 256  ;;  %p163_p1 = scmp.lt.s32.totalorder %s41_s13, %s41_s13 }
   0x5   :  { %p159_p0 = scmp.ne.s32.totalorder %s41_s13, %s158_s16  ;;  %p164_p2 = scmp.lt.s32.totalorder %s158_s16, %s158_s16 }
   0x7   :  { %p165_p3 = por %p164_p2, %p163_p1 }
   0x9   :  { %p166_p4 = pnand %p165_p3, %p159_p0 }
   0xb   :  { %169 = shalt.err (!%p166_p4)
}
   0xc   :  { %s238_s17 = smov 128   ;;  %s239_s18 = smov 8  }
   0xd   :  { %46 = dma.hbm_to_vmem [thread:$0]  %s282_s1, 256, %s41_s13, [#allocation6], %s238_s17, %s238_s17, %s239_s18  }
   0xe   :  { %s178_s21 = scalar_lea.vmem %s23_s15, 256  ;;  %p183_p6 = scmp.lt.s32.totalorder %s23_s15, %s23_s15 }
   0xf   :  { %p179_p5 = scmp.ne.s32.totalorder %s23_s15, %s178_s21  ;;  %p184_p7 = scmp.lt.s32.totalorder %s178_s21, %s178_s21 }
  0x11   :  { %p185_p8 = por %p184_p7, %p183_p6 }
  0x13   :  { %p186_p9 = pnand %p185_p8, %p179_p5 }
  0x15   :  { %189 = shalt.err (!%p186_p9)
}
  0x16   :  { %28 = dma.hbm_to_vmem [thread:$0]  %s281_s0, 256, %s23_s15, [#allocation3], %s238_s17, %s238_s17, %s239_s18  }
  0x17   :  { %s240_s24 = smov [#allocation7]  }
  0x18   :  { %s58_s25 = sshll.u32 %s240_s24, 4  ;;  %s59_s25 = int_to_ptr.vmem [resolvable:$true] %s58_s25 }
  0x19   :  { %s198_s26 = scalar_lea.vmem %s59_s25, 64  ;;  %p203_p11 = scmp.lt.s32.totalorder %s59_s25, %s59_s25 }
  0x1a   :  { %p199_p10 = scmp.ne.s32.totalorder %s59_s25, %s198_s26  ;;  %p204_p12 = scmp.lt.s32.totalorder %s198_s26, %s198_s26 }
  0x1c   :  { %p205_p13 = por %p204_p12, %p203_p11 }
  0x1e   :  { %p206_p0 = pnand %p205_p13, %p199_p10 }
  0x20   :  { %209 = shalt.err (!%p206_p0)
}
  0x21   :  { %s241_s1 = smov 32   ;;  %s242_s27 = smov 2  }
  0x22   :  { %64 = dma.hbm_to_vmem [thread:$0]  %s283_s2, 64, %s59_s25, [#allocation6], %s241_s1, %s241_s1, %s242_s27  }
  0x23   :  { %230 = dma.done.wait [#allocation3], 256  }
  0x24   :  { %231 = vsyncadd [#allocation3], 4294967040 }
  0x25   :  { %232 = dma.done.wait [#allocation6], 320  }
  0x26   :  { %233 = vsyncadd [#allocation6], 4294966976  ;;  %vm90_vm0 = vcmask 130048   ;;  %v243_v0 = vmov 0.0   ;;  %v92_v1 = vld [vmem:[#allocation2] sm:$0xff]  ;;  %v93_v2 = vld [vmem:[#allocation2 + $0x8] sm:$0xff] }
  0x27   :  { %91 = vst.msk [vmem:[#allocation8] sm:$0xff] %vm90_vm0, %v243_v0  ;;  %v94_v3 = vld [vmem:[#allocation5] sm:$0xff]  ;;  %v95_v4 = vld [vmem:[#allocation5 + $0x8] sm:$0xff]  ;;  %v138_v6 = vld [vmem:[#allocation7] sm:$0xf]   ;;  %s244_s0 = smov [#allocation8]  }
  0x28   :  { %v96_v5 = vsub.f32 %v92_v1, %v94_v3  ;;  %v97_v7 = vsub.f32 %v93_v2, %v95_v4  ;;  %v139_v8 = vunpack.c.0.s8 %v138_v6  ;;  %v140_v9 = vunpack.c.1.s8 %v138_v6  ;;  %s121_s2 = sshll.u32 %s244_s0, 4  ;;  %s122_s2 = int_to_ptr.vmem [resolvable:$true] %s121_s2 }
  0x29   :  { %s210_s30 = scalar_lea.vmem %s122_s2, 128  ;;  %p215_p2 = scmp.lt.s32.totalorder %s122_s2, %s122_s2 }
  0x2a   :  { %v98_v10 = vmul.f32 %v96_v5, %v96_v5  ;;  %v99_v11 = vmul.f32 %v97_v7, %v97_v7  ;;  %v104_v12 = vcvt.s32.f32 %v139_v8  ;;  %v105_v13 = vcvt.s32.f32 %v140_v9  ;;  %p211_p1 = scmp.ne.s32.totalorder %s122_s2, %s210_s30  ;;  %p216_p3 = scmp.lt.s32.totalorder %s210_s30, %s210_s30 }
  0x2c   :  { %v106_v14 = vmul.f32 %v104_v12, %v98_v10  ;;  %v107_v15 = vmul.f32 %v105_v13, %v99_v11  ;;  %p217_p4 = por %p216_p3, %p215_p2 }
  0x2e   :  { %v110_v16 = vsel %vm90_vm0, %v106_v14, 0.0  ;;  %v111_v17 = vsel %vm90_vm0, %v107_v15, 0.0  ;;  %v108_v18 = vld [vmem:[#allocation8] sm:$0xff]  ;;  %p218_p5 = pnand %p217_p4, %p211_p1 }
  0x2f   :  { %v112_v19 = vadd.f32 %v111_v17, %v110_v16 }
  0x31   :  { %v113_v20 = vadd.f32 %v112_v19, %v108_v18 }
  0x33   :  { %114 = vst.msk [vmem:[#allocation8] sm:$0xff] %vm90_vm0, %v113_v20 }
  0x34   :  { %221 = shalt.err (!%p218_p5)
}
  0x35   :  { %124 = dma.vmem_to_hbm [thread:$0]  %s122_s2, 128, %s284_s3, [#allocation4]  }
  0x36   :  { %234 = dma.done.wait [#allocation4], 128  }
  0x37   :  { %235 = vsyncadd [#allocation4], 4294967168 }
  0x38   :  { %128 = vsyncpa [#allocation3], 1 }
  0x39   :  { %129 = vsyncpa [#allocation6], 1 }
  0x3a   :  { %130 = vsyncpa [#allocation4], 1 }

</bundles_post_ra>
